<compile_context>
chip_gen: v5e
topology: v5e:2x2
jax: 0.10.0
libtpu: 0.0.40
codegen_flags: <defaults>
</compile_context>

<pallas_src>
import math

import jax
import jax.numpy as jnp
from jax.experimental import pallas as pl
from jax.experimental.pallas import tpu as pltpu

_LANE = 1024  # lane-dense tile width (multiple of 128)


def _laplace_density_kernel(scal_ref, sdf_ref, out_ref):
    # scal_ref: SMEM f32[3] = [alpha, 0.5*alpha, -1/beta]
    alpha = scal_ref[0]
    half_alpha = scal_ref[1]
    neg_inv_beta = scal_ref[2]

    sdf = sdf_ref[...]
    # Math promotes to f32 via the f32 SMEM scalars (works for bf16 sdf too).
    e = jnp.exp(jnp.abs(sdf) * neg_inv_beta)          # single EUP push per vreg
    out = jnp.where(sdf >= 0, half_alpha * e, alpha - half_alpha * e)
    out_ref[...] = out.astype(out_ref.dtype)


def _round_up(x: int, m: int) -> int:
    return ((x + m - 1) // m) * m


def _run_elementwise(scalars, x, block_shape, grid_steps, index_map, cost, out_dtype):
    return pl.pallas_call(
        _laplace_density_kernel,
        out_shape=jax.ShapeDtypeStruct(x.shape, out_dtype),
        grid_spec=pltpu.PrefetchScalarGridSpec(
            num_scalar_prefetch=0,
            grid=(grid_steps,),
            in_specs=[
                pl.BlockSpec(memory_space=pltpu.SMEM),     # hoisted scalars
                pl.BlockSpec(block_shape, index_map),      # sdf tile
            ],
            out_specs=pl.BlockSpec(block_shape, index_map),
        ),
        compiler_params=pltpu.CompilerParams(
            dimension_semantics=("parallel",),
            vmem_limit_bytes=32 * 1024 * 1024,
        ),
        cost_estimate=cost,
    )(scalars, x)


def laplace_density(sdf: jax.Array,
                    beta_param: jax.Array,
                    beta_min: jax.Array,
                    beta=None,
                    *,
                    lane: int = _LANE,
                    max_tile_bytes: int = 4 << 20) -> jax.Array:
    """Pallas implementation of LaplaceDensity.forward (elementwise on sdf)."""
    if beta is None:
        beta = jnp.abs(beta_param) + beta_min          # get_beta(); trivial glue
    beta = jnp.asarray(beta, dtype=jnp.float32).reshape(())

    alpha = 1.0 / beta
    # [alpha, 0.5*alpha, -1/beta]   (note: -1/beta == -alpha)
    scalars = jnp.stack([alpha, 0.5 * alpha, -alpha]).reshape(3).astype(jnp.float32)

    orig_shape = sdf.shape
    orig_dtype = sdf.dtype
    total = math.prod(orig_shape) if orig_shape else 1
    if total == 0:
        return sdf

    itemsize = jnp.dtype(orig_dtype).itemsize
    pack = max(1, 4 // itemsize)        # sublane packing: f32->1, bf16->2, int8/fp8->4
    sublane = 8 * pack                  # dtype-aware sublane rounding

    def rows_budget(cols: int) -> int:  # rows per ~max_tile_bytes tile, sublane-aligned
        return max(sublane, (max_tile_bytes // (cols * itemsize)) // sublane * sublane)

    cost = pl.CostEstimate(
        flops=7 * total,
        transcendentals=total,
        bytes_accessed=2 * total * itemsize + 12,
    )

    # ---- pick a copy-free 2-D view when the shape cooperates ------------------
    rows = cols = None
    if total >= lane and total % lane == 0:
        rows, cols = total // lane, lane
        x2d = sdf.reshape(rows, cols)                      # bitcast, no data movement
    elif (sdf.ndim >= 2 and orig_shape[-1] % 128 == 0
          and orig_shape[-1] * itemsize * sublane <= max_tile_bytes):
        cols = orig_shape[-1]
        rows = total // cols
        x2d = sdf.reshape(rows, cols)                      # collapse leading dims only

    if rows is not None:
        if rows <= sublane:
            block_rows = rows          # single full-array block (exempt from 8-multiple rule)
        else:
            # Cap so there are >= 2 grid steps (both v7x TCs stream); <= ~4 MiB per tile.
            block_rows = min(rows_budget(cols), _round_up(pl.cdiv(rows, 2), sublane))
        grid_steps = pl.cdiv(rows, block_rows)             # last block may be partial
        out2d = _run_elementwise(scalars, x2d, (block_rows, cols), grid_steps,
                                 lambda i: (i, 0), cost, orig_dtype)
        return out2d.reshape(orig_shape)

    # ---- ragged fallback: stay 1-D, no pad / no output slice ------------------
    flat = sdf.reshape(-1)                                 # bitcast
    chunk = sublane * lane                                 # 8192 f32 elems per minimal block
    if total < 2 * chunk:
        block_elems = total            # one block equal to the full array
    else:
        max_block = rows_budget(lane) * lane
        block_elems = min(max_block, _round_up(pl.cdiv(total, 2), chunk))
    grid_steps = pl.cdiv(total, block_elems)               # final block partial -> DMA clamped
    out_flat = _run_elementwise(scalars, flat, (block_elems,), grid_steps,
                                lambda i: (i,), cost, orig_dtype)
    return out_flat.reshape(orig_shape)


def laplace_density_ref(sdf, beta_param, beta_min, beta=None):
    if beta is None:
        beta = jnp.abs(beta_param) + beta_min
    sdf = sdf.astype(jnp.float32)
    alpha = 1.0 / beta
    return alpha * (0.5 + 0.5 * jnp.sign(sdf) * jnp.expm1(-jnp.abs(sdf) / beta))


if __name__ == "__main__":
    key = jax.random.PRNGKey(0)

    # Deterministic "parameters" (module __init__ takes python floats beta, beta_min).
    beta_param = jnp.float32(0.1)   # nn.Parameter(torch.tensor(beta))
    beta_min = jnp.float32(1e-4)    # torch.tensor(beta_min)

    # 1) Aligned fast path: total % 1024 == 0 -> (rows, 1024) tiles, 2 grid steps.
    sdf = jax.random.normal(key, (256, 128), dtype=jnp.float32)
    out = jax.block_until_ready(laplace_density(sdf, beta_param, beta_min))
    ref = laplace_density_ref(sdf, beta_param, beta_min)
    assert out.shape == sdf.shape and out.dtype == sdf.dtype
    assert jnp.allclose(out, ref, atol=1e-5, rtol=1e-5), "mismatch vs reference"

    # 2) Explicit-beta path (forward(sdf, beta=...)).
    out2 = jax.block_until_ready(
        laplace_density(sdf, beta_param, beta_min, beta=jnp.float32(0.05)))
    ref2 = laplace_density_ref(sdf, beta_param, beta_min, beta=jnp.float32(0.05))
    assert jnp.allclose(out2, ref2, atol=1e-5, rtol=1e-5), "mismatch (explicit beta)"

    # 3) Last-dim-aligned path with a partial final 2-D block (no pad, no slice).
    sdf3 = jax.random.normal(jax.random.PRNGKey(1), (100, 128), dtype=jnp.float32)
    out3 = jax.block_until_ready(laplace_density(sdf3, beta_param, beta_min))
    ref3 = laplace_density_ref(sdf3, beta_param, beta_min)
    assert jnp.allclose(out3, ref3, atol=1e-5, rtol=1e-5), "mismatch (2-D partial block)"

    # 4) Ragged small shape -> single full-array 1-D block.
    sdf4 = jax.random.normal(jax.random.PRNGKey(2), (3, 17, 45), dtype=jnp.float32)
    out4 = jax.block_until_ready(laplace_density(sdf4, beta_param, beta_min))
    ref4 = laplace_density_ref(sdf4, beta_param, beta_min)
    assert out4.shape == sdf4.shape
    assert jnp.allclose(out4, ref4, atol=1e-5, rtol=1e-5), "mismatch (ragged single block)"

    # 5) Ragged medium shape -> 1-D multi-block with a partial final block.
    sdf5 = jax.random.normal(jax.random.PRNGKey(3), (5, 4000), dtype=jnp.float32)
    out5 = jax.block_until_ready(laplace_density(sdf5, beta_param, beta_min))
    ref5 = laplace_density_ref(sdf5, beta_param, beta_min)
    assert jnp.allclose(out5, ref5, atol=1e-5, rtol=1e-5), "mismatch (ragged multi block)"

    # 6) bf16 input (dtype-aware sublane rounding; math stays f32 via SMEM scalars).
    sdf6 = jax.random.normal(jax.random.PRNGKey(4), (256, 128), dtype=jnp.bfloat16)
    out6 = jax.block_until_ready(laplace_density(sdf6, beta_param, beta_min))
    ref6 = laplace_density_ref(sdf6, beta_param, beta_min)
    assert out6.dtype == jnp.bfloat16
    assert jnp.allclose(out6.astype(jnp.float32), ref6, atol=5e-2, rtol=5e-2), "mismatch (bf16)"

    print("KERNEL_OK")
</pallas_src>

<mosaic_0001>
module attributes {stable_mosaic.version = 11 : i64} {
  func.func @_laplace_density_kernel(%arg0: i32, %arg1: memref<3xf32, #tpu.memory_space<smem>>, %arg2: memref<16x1024xf32, #tpu.memory_space<vmem>>, %arg3: memref<16x1024xf32, #tpu.memory_space<vmem>>) attributes {dimension_semantics = [#tpu.dimension_semantics<parallel>], iteration_bounds = array<i64: 2>, scalar_prefetch = 0 : i64, scratch_operands = 0 : i64, tpu.core_type = #tpu.core_type<tc>, window_params = [{transform_indices = @transform_0, window_bounds = array<i64: 3>}, {transform_indices = @transform_1, window_bounds = array<i64: 16, 1024>}, {transform_indices = @transform_2, window_bounds = array<i64: 16, 1024>}]} {
    %c0 = arith.constant 0 : index
    %0 = memref.load %arg1[%c0] : memref<3xf32, #tpu.memory_space<smem>>
    %c1 = arith.constant 1 : index
    %1 = memref.load %arg1[%c1] : memref<3xf32, #tpu.memory_space<smem>>
    %c2 = arith.constant 2 : index
    %2 = memref.load %arg1[%c2] : memref<3xf32, #tpu.memory_space<smem>>
    %c0_0 = arith.constant 0 : index
    %c0_1 = arith.constant 0 : index
    %3 = vector.load %arg2[%c0_0, %c0_1] : memref<16x1024xf32, #tpu.memory_space<vmem>>, vector<16x1024xf32>
    %4 = math.absf %3 : vector<16x1024xf32>
    %5 = vector.broadcast %2 : f32 to vector<16x1024xf32>
    %6 = arith.mulf %4, %5 : vector<16x1024xf32>
    %7 = math.exp %6 : vector<16x1024xf32>
    %cst = arith.constant 0.000000e+00 : f32
    %8 = vector.broadcast %cst : f32 to vector<16x1024xf32>
    %9 = arith.cmpf oge, %3, %8 : vector<16x1024xf32>
    %10 = vector.broadcast %1 : f32 to vector<16x1024xf32>
    %11 = arith.mulf %10, %7 : vector<16x1024xf32>
    %12 = vector.broadcast %1 : f32 to vector<16x1024xf32>
    %13 = arith.mulf %12, %7 : vector<16x1024xf32>
    %14 = vector.broadcast %0 : f32 to vector<16x1024xf32>
    %15 = arith.subf %14, %13 : vector<16x1024xf32>
    %16 = arith.select %9, %11, %15 : vector<16x1024xi1>, vector<16x1024xf32>
    %c0_2 = arith.constant 0 : index
    %c0_3 = arith.constant 0 : index
    %17 = vector.load %arg3[%c0_2, %c0_3] : memref<16x1024xf32, #tpu.memory_space<vmem>>, vector<16x1024xf32>
    tpu.vector_store %arg3[%c0_2, %c0_3], %16 {strides = array<i32>} : memref<16x1024xf32, #tpu.memory_space<vmem>>, vector<16x1024xf32>,
    return
  }
  func.func @transform_0(%arg0: i32) -> i32 {
    %c0_i32 = arith.constant 0 : i32
    %c0_i32_0 = arith.constant 0 : i32
    return %c0_i32 : i32
  }
  func.func @transform_1(%arg0: i32) -> (i32, i32) {
    %c0_i32 = arith.constant 0 : i32
    %c0_i32_0 = arith.constant 0 : i32
    return %arg0, %c0_i32 : i32, i32
  }
  func.func @transform_2(%arg0: i32) -> (i32, i32) {
    %c0_i32 = arith.constant 0 : i32
    %c0_i32_0 = arith.constant 0 : i32
    return %arg0, %c0_i32 : i32, i32
  }
}

</mosaic_0001>

<bundles_post_ra>
// kernel: tpu_custom_call.1
= control target key start
LH: loop header
LB: loop body
LE: loop exit
PB: predicated region body
PF: predicated region fallthrough
CT: control target
= control target key end

     0   :  { %7 = vsyncpa [#allocation5], 0  ;;  %s1039_s0 = inlined_call_operand.hbm [shape: f32[3], index: 0, kind: input, shape index: {}]   ;;  %s1040_s1 = inlined_call_operand.hbm [shape: f32[32,1024], index: 1, kind: input, shape index: {}]   ;;  %s1041_s2 = inlined_call_operand.hbm [shape: f32[32,1024], index: 2, kind: output, shape index: {}]  }
   0x1   :  { %8 = vsyncpa [#allocation3], 0 }
   0x2   :  { %10 = vsyncpa [#allocation3 + $0x1], 0 }
   0x3   :  { %11 = vsyncpa [#allocation4], 0 }
   0x4   :  { %13 = vsyncpa [#allocation4 + $0x1], 0  ;;  %s703_s9 = smov 0   ;;  %s705_s10 = smov 0  }
   0x5   :  { %s707_s11 = smov 0   ;;  %s709_s12 = smov 0  }
   0x6 LB: > { %s724_s13 = sadd.s32 4294967295, %s681_s12   ;;  %s449_s14 = sadd.s32 4294967294, %s681_s12   ;;  %s681_s12 = sphi %s709_s12, %s1052_s12   ;;  %s677_s11 = sphi %s707_s11, %s1051_s11   ;;  %s673_s10 = sphi %s705_s10, %s1050_s10   ;;  %s669_s9 = sphi %s703_s9, %s1049_s9  }
   0x7   : > { %s728_s15 = sadd.s32 1, %s681_s12   ;;  %s47_s16 = sadd.s32 1, %s677_s11 }
   0x8   : > { %s44_s17 = ssub.s32 %s681_s12, %s728_s15  ;;  %p54_p0 = scmp.ne.s32.totalorder %s677_s11, %s673_s10 }
   0x9   : > { %p45_p1 = scmp.eq.s32.totalorder %s44_s17, 0  ;;  %p55_p2 = scmp.eq.s32.totalorder %s681_s12, 0 }
   0xa   : > { %p60_p3 = scmp.ne.s32.totalorder %s673_s10, %s669_s9  ;;  %p61_p4 = scmp.eq.s32.totalorder %s724_s13, 0 }
   0xb   : > { %s740_s18 = scalar_select %p45_p1, %s677_s11, %s47_s16  }
   0xc   : > { %p742_p5 = por %p55_p2, %p54_p0  ;;  %p748_p6 = por %p61_p4, %p60_p3 }
   0xd   : > { %p84_p7 = scmp.eq.s32.totalorder %s724_s13, 1  ;;  %p90_p8 = scmp.eq.s32.totalorder %s449_s14, 1 }
   0xe   : > { %p450_p9 = scmp.ge.s32.totalorder %s681_s12, 1  ;;  %p97_p10 = scmp.lt.s32.totalorder %s681_s12, 3 }
   0xf   : > { %p755_p11 = por %p84_p7, %p54_p0  ;;  %p759_p12 = por %p90_p8, %p60_p3 }
  0x10   : > { %p763_p13 = pnand %p450_p9, %p97_p10  ;;  %s109_s26 = sshll.u32 %s1039_s0, 4  ;;  %s110_s26 = int_to_ptr.hbm [resolvable:$true] %s109_s26 }
  0x11   : > { %p494_p2 = scmp.lt.s32.totalorder %s681_s12, 2  ;;  %s120_s27 = sand.u32 1, %s677_s11  }
  0x12   : > { %p481_p1 = pneg %p763_p13  ;;  %s453_s29 = sshll.u32 %s120_s27, 7 }
  0x13   : > { %p779_p3 = pnand %p494_p2, %p742_p5  ;;  %s683_s30 = smov [#allocation2]  }
  0x14   : > { %p482_p7 = pnand %p481_p1, %p61_p4  ;;  %s470_s3 = sshll.u32 %s681_s12, 7 }
  0x15   : > { %s124_s4 = scalar_lea.vmem [#allocation6], %s453_s29  ;;  %s130_s8 = scalar_lea.hbm %s1040_s1, %s470_s3 }
  0x16   : > { %484 = dma.hbm_to_smem (!%p482_p7), %s110_s26, 16, %s683_s30, [#allocation5]  }
  0x17   : > { %s133_s5 = sshll.u32 %s124_s4, 4  ;;  %s131_s14 = sshll.u32 %s130_s8, 4  ;;  %s134_s5 = int_to_ptr.vmem [resolvable:$true] %s133_s5  ;;  %s132_s14 = int_to_ptr.hbm [resolvable:$true] %s131_s14 }
  0x18   : > { %s121_s16 = scalar_lea.sflag [#allocation3], %s120_s27  ;;  %s581_s17 = sshra.s32 %s132_s14, 4  ;;  %s582_s17 = int_to_ptr.hbm [resolvable:$true] %s581_s17 }
  0x19   : > { %s583_s19 = scalar_lea.hbm %s582_s17, 128  ;;  %p585_p8 = pneg %p779_p3 }
  0x1a   : > { %p584_p5 = scmp.ne.s32.totalorder %s582_s17, %s583_s19  ;;  %s588_s26 = scalar_lea.hbm %s1040_s1, 256 }
  0x1b   : > { %p589_p1 = scmp.lt.s32.totalorder %s582_s17, %s1040_s1  ;;  %p590_p2 = scmp.lt.s32.totalorder %s588_s26, %s583_s19 }
  0x1c   : > { %p586_p9 = pnand %p585_p8, %p584_p5 }
  0x1d   : > { %p591_p7 = por %p590_p2, %p589_p1 }
  0x1e   : > { %p587_p10 = pneg %p586_p9 }
  0x20   : > { %p592_p0 = pnand %p591_p7, %p587_p10 }
  0x22   : > { %595 = shalt.err (!%p592_p0)
}
  0x23   : > { %s684_s27 = smov 1024   ;;  %s685_s3 = smov 64  }
  0x24   : > { %488 = dma.hbm_to_vmem [thread:$0]  (!%p779_p3), %s132_s14, 2048, %s134_s5, %s121_s16, %s684_s27, %s684_s27, %s685_s3  }
  0x25   : > { %145 = sbr.rel (%p763_p13) target bundleno = 92 (0x5c), region = 28 }
  0x2a   : > { %656 = dma.done.wait (%p61_p4), [#allocation5], 16  }
  0x2b   : > { %658 = vsyncadd (%p61_p4), [#allocation5], 4294967280  ;;  %s804_s4 = sand.u32 1, %s673_s10  }
  0x2c   : > { %s459_s6 = sshll.u32 %s804_s4, 7  ;;  %s153_s7 = scalar_lea.sflag [#allocation3], %s804_s4 }
  0x2d   : > { %s810_s28 = scalar_lea.vmem [#allocation6], %s459_s6 }
  0x2e   : > { %660 = dma.done.wait (%p748_p6), %s153_s7, 2048  }
  0x2f   : > { %662 = vsyncadd (%p748_p6), %s153_s7, 4294965248 }
  0x30   : > { %162 = sfence }
  0x31   : > { %v817_v0 = vld [vmem:[%s810_s28] sm:$0xff]  ;;  %s819_s23 = sld [smem:[#allocation2]]  ;;  %v822_v1 = vld [vmem:[%s810_s28 + $0x8] sm:$0xff]  ;;  %v825_v2 = vld [vmem:[%s810_s28 + $0x10] sm:$0xff]  ;;  %s928_s8 = scalar_lea.vmem [#allocation7], %s459_s6 }
  0x32   : > { %s462_s20 = sld [smem:[#allocation2 + $0x2]]  ;;  %v200_v3 = vand.u32 2147483647, %v817_v0  ;;  %v829_v4 = vld [vmem:[%s810_s28 + $0x18] sm:$0xff]  ;;  %v832_v5 = vld [vmem:[%s810_s28 + $0x20] sm:$0xff]  ;;  %v835_v6 = vld [vmem:[%s810_s28 + $0x28] sm:$0xff] }
  0x33   : > { %v201_v7 = vand.u32 2147483647, %v822_v1  ;;  %v202_v8 = vand.u32 2147483647, %v825_v2  ;;  %v203_v9 = vand.u32 2147483647, %v829_v4 }
  0x34   : > { %v204_v10 = vand.u32 2147483647, %v832_v5  ;;  %v842_v11 = vld [vmem:[%s810_s28 + $0x30] sm:$0xff]  ;;  %v845_v12 = vld [vmem:[%s810_s28 + $0x38] sm:$0xff]  ;;  %v848_v13 = vld [vmem:[%s810_s28 + $0x40] sm:$0xff]  ;;  %s855_s5 = sld [smem:[#allocation2 + $0x1]] }
  0x35   : > { %v205_v14 = vand.u32 2147483647, %v835_v6  ;;  %v206_v15 = vand.u32 2147483647, %v842_v11  ;;  %v853_v16 = vld [vmem:[%s810_s28 + $0x48] sm:$0xff]  ;;  %v858_v17 = vld [vmem:[%s810_s28 + $0x50] sm:$0xff] }
  0x36   : > { %v207_v19 = vand.u32 2147483647, %v845_v12  ;;  %v208_v20 = vand.u32 2147483647, %v848_v13  ;;  %v209_v21 = vand.u32 2147483647, %v853_v16 }
  0x37   : > { %v210_v29 = vand.u32 2147483647, %v858_v17  ;;  %v875_v35 = vld [vmem:[%s810_s28 + $0x58] sm:$0xff]  ;;  %v878_v36 = vld [vmem:[%s810_s28 + $0x60] sm:$0xff]  ;;  %vm265_vm0 = vcmp.ge.f32.partialorder %v817_v0, 0.0  ;;  %v882_v37 = vstv %s819_s23  ;;  %v886_v40 = vld [vmem:[%s810_s28 + $0x68] sm:$0xff] }
  0x38   : > { %v860_v18 = vstv %s462_s20  ;;  %vm266_vm1 = vcmp.ge.f32.partialorder %v822_v1, 0.0  ;;  %vm267_vm2 = vcmp.ge.f32.partialorder %v825_v2, 0.0  ;;  %v211_v45 = vand.u32 2147483647, %v875_v35  ;;  %v895_v47 = vld [vmem:[%s810_s28 + $0x70] sm:$0xff]  ;;  %v903_v51 = vld [vmem:[%s810_s28 + $0x78] sm:$0xff] }
  0x39   : > { %v217_v22 = vmul.f32 %v860_v18, %v200_v3  ;;  %v218_v23 = vmul.f32 %v860_v18, %v201_v7  ;;  %v219_v24 = vmul.f32 %v860_v18, %v202_v8  ;;  %v220_v25 = vmul.f32 %v860_v18, %v203_v9  ;;  %s472_s14 = sshll.u32 %s724_s13, 7  ;;  %s361_s19 = sshll.u32 %s928_s8, 4  ;;  %s362_s19 = int_to_ptr.vmem [resolvable:$true] %s361_s19 }
  0x3a   : > { %v221_v26 = vmul.f32 %v860_v18, %v204_v10  ;;  %v222_v27 = vmul.f32 %v860_v18, %v205_v14  ;;  %v223_v28 = vmul.f32 %v860_v18, %v206_v15  ;;  %v224_v34 = vmul.f32 %v860_v18, %v207_v19  ;;  %s972_s17 = scalar_lea.hbm %s1041_s2, %s472_s14  ;;  %s348_s25 = scalar_lea.sflag [#allocation4], %s804_s4 }
  0x3b   : > { %v233_v30 = vmul.f32 1.442695, %v217_v22  ;;  %v235_v31 = vmul.f32 1.442695, %v218_v23  ;;  %v237_v32 = vmul.f32 1.442695, %v219_v24  ;;  %v225_v39 = vmul.f32 %v860_v18, %v208_v20 }
  0x3c   : > { %v239_v33 = vmul.f32 1.442695, %v220_v25  ;;  %v241_v38 = vmul.f32 1.442695, %v221_v26  ;;  %v243_v41 = vmul.f32 1.442695, %v222_v27  ;;  %v226_v43 = vmul.f32 %v860_v18, %v209_v21 }
  0x3d   : > { %534 = vpow2.f32 %v233_v30  ;;  %v245_v42 = vmul.f32 1.442695, %v223_v28  ;;  %v227_v44 = vmul.f32 %v860_v18, %v210_v29  ;;  %v212_v46 = vand.u32 2147483647, %v878_v36  ;;  %s363_s24 = sshll.u32 %s972_s17, 4  ;;  %s631_s3 = scalar_lea.hbm %s1041_s2, 256  ;;  %s364_s24 = int_to_ptr.hbm [resolvable:$true] %s363_s24 }
  0x3e   : > { %536 = vpow2.f32 %v235_v31  ;;  %v898_v48 = vstv %s855_s5  ;;  %vm268_vm3 = vcmp.ge.f32.partialorder %v829_v4, 0.0  ;;  %v247_v49 = vmul.f32 1.442695, %v224_v34  ;;  %s625_s26 = sshra.s32 %s364_s24, 4  ;;  %s626_s26 = int_to_ptr.hbm [resolvable:$true] %s625_s26 }
  0x3f   : > { %538 = vpow2.f32 %v237_v32  ;;  %v213_v50 = vand.u32 2147483647, %v886_v40  ;;  %vm269_vm4 = vcmp.ge.f32.partialorder %v832_v5, 0.0  ;;  %v249_v52 = vmul.f32 1.442695, %v225_v39  ;;  %s627_s29 = scalar_lea.hbm %s626_s26, 128  ;;  %p632_p0 = scmp.lt.s32.totalorder %s626_s26, %s1041_s2 }
  0x40   : > { %540 = vpow2.f32 %v239_v33  ;;  %v228_v53 = vmul.f32 %v860_v18, %v211_v45  ;;  %v229_v54 = vmul.f32 %v860_v18, %v212_v46  ;;  %vm270_vm5 = vcmp.ge.f32.partialorder %v835_v6, 0.0  ;;  %p628_p4 = scmp.ne.s32.totalorder %s626_s26, %s627_s29  ;;  %p633_p3 = scmp.lt.s32.totalorder %s631_s3, %s627_s29 }
  0x41   : > { %542 = vpow2.f32 %v241_v38  ;;  %v251_v55 = vmul.f32 1.442695, %v226_v43  ;;  %v230_v56 = vmul.f32 %v860_v18, %v213_v50  ;;  %v214_v57 = vand.u32 2147483647, %v895_v47 }
  0x42   : > { %544 = vpow2.f32 %v243_v41  ;;  %vm271_vm6 = vcmp.ge.f32.partialorder %v842_v11, 0.0  ;;  %v253_v59 = vmul.f32 1.442695, %v227_v44  ;;  %v255_v60 = vmul.f32 1.442695, %v228_v53  ;;  %p629_p6 = pnand %p628_p4, %p755_p11  ;;  %p634_p5 = por %p633_p3, %p632_p0 }
  0x43   : > { %v535_v58 = vpop.eup %534  ;;  %546 = vpow2.f32 %v245_v42  ;;  %v215_v61 = vand.u32 2147483647, %v903_v51  ;;  %vm272_vm7 = vcmp.ge.f32.partialorder %v845_v12, 0.0  ;;  %v257_v3 = vmul.f32 1.442695, %v229_v54 }
  0x44   : > { %v537_v62 = vpop.eup %536  ;;  %v282_v63 = vmul.f32 %v535_v58, %v898_v48  ;;  %548 = vpow2.f32 %v247_v49  ;;  %v231_v7 = vmul.f32 %v860_v18, %v214_v57  ;;  %v259_v10 = vmul.f32 1.442695, %v230_v56  ;;  %p630_p13 = pneg %p629_p6 }
  0x45   : > { %v539_v8 = vpop.eup %538  ;;  %v283_v9 = vmul.f32 %v537_v62, %v898_v48  ;;  %550 = vpow2.f32 %v249_v52  ;;  %v232_v14 = vmul.f32 %v860_v18, %v215_v61  ;;  %vm273_vm8 = vcmp.ge.f32.partialorder %v848_v13, 0.0 }
  0x46   : > { %v541_v15 = vpop.eup %540  ;;  %v299_v19 = vsub.f32 %v882_v37, %v282_v63  ;;  %v284_v20 = vmul.f32 %v539_v8, %v898_v48  ;;  %552 = vpow2.f32 %v251_v55  ;;  %v261_v21 = vmul.f32 1.442695, %v231_v7  ;;  %p635_p8 = pnand %p634_p5, %p630_p13 }
  0x47   : > { %v543_v22 = vpop.eup %542  ;;  %v300_v23 = vsub.f32 %v882_v37, %v283_v9  ;;  %v285_v24 = vmul.f32 %v541_v15, %v898_v48  ;;  %554 = vpow2.f32 %v253_v59  ;;  %v263_v25 = vmul.f32 1.442695, %v232_v14 }
  0x48   : > { %v545_v26 = vpop.eup %544  ;;  %v315_v27 = vsel %vm265_vm0, %v282_v63, %v299_v19  ;;  %v301_v18 = vsub.f32 %v882_v37, %v284_v20  ;;  %v286_v28 = vmul.f32 %v543_v22, %v898_v48  ;;  %556 = vpow2.f32 %v255_v60 }
  0x49   : > { %v547_v29 = vpop.eup %546  ;;  %331 = vst [vmem:[%s928_s8] sm:$0xff] %v315_v27  ;;  %v316_v30 = vsel %vm266_vm1, %v283_v9, %v300_v23  ;;  %v302_v31 = vsub.f32 %v882_v37, %v285_v24  ;;  %v287_v0 = vmul.f32 %v545_v26, %v898_v48  ;;  %558 = vpow2.f32 %v257_v3 }
  0x4a   : > { %v549_v32 = vpop.eup %548  ;;  %332 = vst [vmem:[%s928_s8 + $0x8] sm:$0xff] %v316_v30  ;;  %v317_v33 = vsel %vm267_vm2, %v284_v20, %v301_v18  ;;  %v303_v34 = vsub.f32 %v882_v37, %v286_v28  ;;  %v288_v38 = vmul.f32 %v547_v29, %v898_v48  ;;  %560 = vpow2.f32 %v259_v10 }
  0x4b   : > { %v551_v1 = vpop.eup %550  ;;  %333 = vst [vmem:[%s928_s8 + $0x10] sm:$0xff] %v317_v33  ;;  %v318_v39 = vsel %vm268_vm3, %v285_v24, %v302_v31  ;;  %v304_v41 = vsub.f32 %v882_v37, %v287_v0  ;;  %v289_v42 = vmul.f32 %v549_v32, %v898_v48  ;;  %562 = vpow2.f32 %v261_v21 }
  0x4c   : > { %v553_v2 = vpop.eup %552  ;;  %334 = vst [vmem:[%s928_s8 + $0x18] sm:$0xff] %v318_v39  ;;  %v319_v43 = vsel %vm269_vm4, %v286_v28, %v303_v34  ;;  %v305_v44 = vsub.f32 %v882_v37, %v288_v38  ;;  %v290_v45 = vmul.f32 %v551_v1, %v898_v48  ;;  %564 = vpow2.f32 %v263_v25 }
  0x4d   : > { %v555_v4 = vpop.eup %554  ;;  %335 = vst [vmem:[%s928_s8 + $0x20] sm:$0xff] %v319_v43  ;;  %v320_v46 = vsel %vm270_vm5, %v287_v0, %v304_v41  ;;  %v306_v49 = vsub.f32 %v882_v37, %v289_v42  ;;  %v291_v5 = vmul.f32 %v553_v2, %v898_v48  ;;  %vm274_vm9 = vcmp.ge.f32.partialorder %v853_v16, 0.0 }
  0x4e   : > { %v557_v50 = vpop.eup %556  ;;  %336 = vst [vmem:[%s928_s8 + $0x28] sm:$0xff] %v320_v46  ;;  %v321_v52 = vsel %vm271_vm6, %v288_v38, %v305_v44  ;;  %v307_v53 = vsub.f32 %v882_v37, %v290_v45  ;;  %v292_v6 = vmul.f32 %v555_v4, %v898_v48  ;;  %vm275_vm10 = vcmp.ge.f32.partialorder %v858_v17, 0.0 }
  0x4f   : > { %v559_v54 = vpop.eup %558  ;;  %337 = vst [vmem:[%s928_s8 + $0x30] sm:$0xff] %v321_v52  ;;  %v322_v55 = vsel %vm272_vm7, %v289_v42, %v306_v49  ;;  %v308_v56 = vsub.f32 %v882_v37, %v291_v5  ;;  %v293_v11 = vmul.f32 %v557_v50, %v898_v48  ;;  %vm276_vm11 = vcmp.ge.f32.partialorder %v875_v35, 0.0 }
  0x50   : > { %v561_v57 = vpop.eup %560  ;;  %338 = vst [vmem:[%s928_s8 + $0x38] sm:$0xff] %v322_v55  ;;  %v323_v58 = vsel %vm273_vm8, %v290_v45, %v307_v53  ;;  %v309_v12 = vsub.f32 %v882_v37, %v292_v6  ;;  %v294_v59 = vmul.f32 %v559_v54, %v898_v48  ;;  %vm277_vm12 = vcmp.ge.f32.partialorder %v878_v36, 0.0 }
  0x51   : > { %v563_v60 = vpop.eup %562  ;;  %339 = vst [vmem:[%s928_s8 + $0x40] sm:$0xff] %v323_v58  ;;  %v324_v61 = vsel %vm274_vm9, %v291_v5, %v308_v56  ;;  %v310_v62 = vsub.f32 %v882_v37, %v293_v11  ;;  %v295_v13 = vmul.f32 %v561_v57, %v898_v48  ;;  %vm278_vm13 = vcmp.ge.f32.partialorder %v886_v40, 0.0 }
  0x52   : > { %v565_v63 = vpop.eup %564  ;;  %340 = vst [vmem:[%s928_s8 + $0x48] sm:$0xff] %v324_v61  ;;  %v325_v3 = vsel %vm275_vm10, %v292_v6, %v309_v12  ;;  %v311_v7 = vsub.f32 %v882_v37, %v294_v59  ;;  %v296_v16 = vmul.f32 %v563_v60, %v898_v48  ;;  %vm279_vm14 = vcmp.ge.f32.partialorder %v895_v47, 0.0 }
  0x53   : > { %341 = vst [vmem:[%s928_s8 + $0x50] sm:$0xff] %v325_v3  ;;  %v326_v8 = vsel %vm276_vm11, %v293_v11, %v310_v62  ;;  %v312_v9 = vsub.f32 %v882_v37, %v295_v13  ;;  %v297_v17 = vmul.f32 %v565_v63, %v898_v48  ;;  %vm280_vm15 = vcmp.ge.f32.partialorder %v903_v51, 0.0 }
  0x54   : > { %342 = vst [vmem:[%s928_s8 + $0x58] sm:$0xff] %v326_v8  ;;  %v327_v40 = vsel %vm277_vm12, %v294_v59, %v311_v7  ;;  %v313_v10 = vsub.f32 %v882_v37, %v296_v16 }
  0x55   : > { %343 = vst [vmem:[%s928_s8 + $0x60] sm:$0xff] %v327_v40  ;;  %v328_v35 = vsel %vm278_vm13, %v295_v13, %v312_v9  ;;  %v314_v14 = vsub.f32 %v882_v37, %v297_v17 }
  0x56   : > { %344 = vst [vmem:[%s928_s8 + $0x68] sm:$0xff] %v328_v35  ;;  %v329_v47 = vsel %vm279_vm14, %v296_v16, %v313_v10 }
  0x57   : > { %345 = vst [vmem:[%s928_s8 + $0x70] sm:$0xff] %v329_v47  ;;  %v330_v15 = vsel %vm280_vm15, %v297_v17, %v314_v14 }
  0x58   : > { %346 = vst [vmem:[%s928_s8 + $0x78] sm:$0xff] %v330_v15 }
  0x59   : > { %638 = shalt.err (!%p635_p8)
}
  0x5a   : > { %s686_s4 = smov 1024   ;;  %s687_s28 = smov 64  }
  0x5b   : > { %479 = dma.vmem_to_hbm [thread:$0]  (%p755_p11), %s362_s19, 2048, %s364_s24, %s348_s25, %s686_s4, %s686_s4, %s687_s28  }
  0x5c PF: > { %s378_s23 = sand.u32 1, %s669_s9   ;;  %p1048_p9 = scmp.ge.s32.totalorder %s681_s12, 2 }
  0x5d   : > { %s379_s20 = scalar_lea.sflag [#allocation4], %s378_s23 }
  0x5e   : > { %p490_p10 = pnand %p1048_p9, %p759_p12 }
  0x60   : > { %p491_p1 = pneg %p490_p10 }
  0x62   : > { %664 = dma.done.wait (%p491_p1), %s379_s20, 2048  }
  0x63   : > { %666 = vsyncadd (%p491_p1), %s379_s20, 4294965248  ;;  %p16_p2 = scmp.ge.s32.totalorder %s728_s15, 4   ;;  %s1049_s9 = smov %s673_s10 }
  0x64   : > { %s1050_s10 = smov %s677_s11  ;;  %s1051_s11 = smov %s740_s18 }
  0x65   : > { %s1052_s12 = smov %s728_s15  ;;  %18 = sbr.rel (!%p16_p2) target bundleno = 6 (0x6), region = 78 }
  0x6a   :  { %385 = vsyncpa [#allocation3], 1 }
  0x6b   :  { %387 = vsyncpa [#allocation3 + $0x1], 1 }
  0x6c   :  { %388 = vsyncpa [#allocation4], 1 }
  0x6d   :  { %390 = vsyncpa [#allocation4 + $0x1], 1 }
  0x6e   :  { %391 = vsyncpa [#allocation5], 1 }
  0x6f   :  { %393 = vsyncpa [#allocation5 + $0x1], 1 }

</bundles_post_ra>
